<compile_context>
chip_gen: v6e
topology: v6e:2x2x1
jax: 0.10.0
libtpu: 0.0.40
codegen_flags: <defaults>
</compile_context>

<pallas_src>
import functools

import jax
import jax.numpy as jnp
from jax.experimental import pallas as pl
from jax.experimental.pallas import tpu as pltpu


# ---------------------------------------------------------------------------
# PyTorch-exact 1-D bilinear interpolation weights (align_corners=False).
# ---------------------------------------------------------------------------
def _bilinear_matrix(in_size: int, out_size: int) -> jnp.ndarray:
    """Returns W of shape (out_size, in_size) such that out = W @ in (1-D)."""
    scale = in_size / out_size
    o = jnp.arange(out_size, dtype=jnp.float32)
    src = (o + 0.5) * scale - 0.5
    src = jnp.maximum(src, 0.0)                      # PyTorch clamps negative src to 0
    i0 = jnp.floor(src).astype(jnp.int32)
    i0 = jnp.minimum(i0, in_size - 1)
    i1 = jnp.minimum(i0 + 1, in_size - 1)
    lam = src - i0.astype(jnp.float32)
    w0 = jax.nn.one_hot(i0, in_size, dtype=jnp.float32) * (1.0 - lam)[:, None]
    w1 = jax.nn.one_hot(i1, in_size, dtype=jnp.float32) * lam[:, None]
    return w0 + w1


def _physical_vmem_bytes() -> int:
    """Generation-aware VMEM size; conservative (v7x = 64 MiB) if unknown."""
    try:
        return int(pltpu.get_tpu_info().vmem_capacity_bytes)
    except Exception:
        return 64 * 1024 * 1024


# ---------------------------------------------------------------------------
# Kernel: per (batch, output-channel tile)
#   W-resize (one matmul over all Cg channels)
#   -> fused H-resize + 1x1 channel mix (one matmul with kron(conv_w, Wh))
#   -> + bias column + residual, single store of the whole output slab.
# ---------------------------------------------------------------------------
def _ffm_kernel(a_ref, wwT_ref, cb_ref, g_ref, f_ref, o_ref):
    # (Cg*Hin, Win) @ (Win, Wout) -> (Cg*Hin, Wout), f32 accumulation.
    r1 = jnp.dot(g_ref[0], wwT_ref[...], preferred_element_type=jnp.float32)
    # (cf_tile*Hout, Cg*Hin) @ (Cg*Hin, Wout) -> (cf_tile*Hout, Wout); one cast of
    # the small low-res intermediate back to the MXU compute dtype.
    slab = jnp.dot(a_ref[...], r1.astype(a_ref.dtype),
                   preferred_element_type=jnp.float32)
    # Bias (per-row column broadcast) + residual; one wide store of the whole slab.
    o_ref[0] = (slab + cb_ref[...] + f_ref[0].astype(jnp.float32)).astype(o_ref.dtype)


def feature_fusion_module(global_feature, feature, conv_weight, conv_bias, *,
                          compute_dtype=jnp.bfloat16, channel_tile=None,
                          donate_feature=True):
    """
    global_feature: (N, Cg, Hin, Win)   NCHW
    feature:        (N, Cf, Hout, Wout) NCHW  (DONATED into the output by default)
    conv_weight:    (Cf, Cg, 1, 1)      PyTorch Conv2d layout
    conv_bias:      (Cf,)
    returns:        (N, Cf, Hout, Wout), dtype of `feature`
    """
    N, Cg, Hin, Win = global_feature.shape
    Nf, Cf, Hout, Wout = feature.shape
    assert Nf == N

    comp_bytes = jnp.dtype(compute_dtype).itemsize
    res_bytes = jnp.dtype(feature.dtype).itemsize

    # ---- free reshapes only on the big streams (no HBM transpose passes) ----
    g2 = global_feature.reshape(N, Cg * Hin, Win).astype(compute_dtype)
    f2 = feature.reshape(N, Cf * Hout, Wout)              # residual path stays f32

    # ---- separable bilinear weights + fused (1x1 conv  x  H-resize) matrix ----
    wh = _bilinear_matrix(Hin, Hout)                       # (Hout, Hin)
    wwT = _bilinear_matrix(Win, Wout).T.astype(compute_dtype)   # (Win, Wout)
    cw = conv_weight.reshape(Cf, Cg).astype(jnp.float32)
    # A[(f,Ho), (c,hi)] = cw[f,c] * wh[Ho,hi]  (kron over channel x H axes).
    A = (cw[:, None, :, None] * wh[None, :, None, :]
         ).reshape(Cf * Hout, Cg * Hin).astype(compute_dtype)
    # Bias as a per-output-row column vector (VMEM, broadcast over lanes).
    cbcol = jnp.repeat(conv_bias.reshape(Cf).astype(jnp.float32), Hout)[:, None]

    # ---- generation-aware channel tiling (default: no tiling at all) ----------
    phys_vmem = _physical_vmem_bytes()
    budget = 28 * 1024 * 1024 if phys_vmem <= 64 * 1024 * 1024 else 88 * 1024 * 1024

    def vmem_need(ct):
        blk = 0
        blk += ct * Hout * Cg * Hin * comp_bytes           # A tile
        blk += Win * Wout * comp_bytes                      # WwT
        blk += ct * Hout * 4                                # bias column
        blk += Cg * Hin * Win * comp_bytes                  # g slab
        blk += ct * Hout * Wout * res_bytes                 # residual block
        blk += ct * Hout * Wout * res_bytes                 # output block
        return 2 * blk + (1 << 20)                          # double buffering + slack

    if channel_tile is None:
        channel_tile = Cf                                    # fewest grid steps
        if vmem_need(Cf) > budget:
            divisors = [t for t in range(Cf - 1, 0, -1)
                        if Cf % t == 0 and (t * Hout) % 8 == 0]
            for t in divisors:
                if vmem_need(t) <= budget:
                    channel_tile = t
                    break
            else:
                channel_tile = divisors[-1] if divisors else Cf
    assert Cf % channel_tile == 0
    assert channel_tile == Cf or (channel_tile * Hout) % 8 == 0
    n_ctiles = Cf // channel_tile

    need = vmem_need(channel_tile)
    vmem_limit = int(min(max(2 * need, 32 * 1024 * 1024), budget))
    vmem_limit = max(vmem_limit, int(need) + (1 << 20))      # never below actual need

    # ---- cost estimate: bandwidth-dominated op ---------------------------------
    flops = (2 * N * (Cg * Hin * Win * Wout + Cf * Hout * Cg * Hin * Wout)
             + 2 * N * Cf * Hout * Wout)
    bytes_accessed = (N * (2 * Cf * Hout * Wout * res_bytes + Cg * Hin * Win * comp_bytes)
                      + Cf * Hout * Cg * Hin * comp_bytes
                      + Win * Wout * comp_bytes + Cf * Hout * 4)
    cost = pl.CostEstimate(flops=int(flops), transcendentals=0,
                           bytes_accessed=int(bytes_accessed))

    out = pl.pallas_call(
        _ffm_kernel,
        out_shape=jax.ShapeDtypeStruct((N, Cf * Hout, Wout), feature.dtype),
        grid_spec=pltpu.PrefetchScalarGridSpec(
            num_scalar_prefetch=0,
            grid=(N, n_ctiles),
            in_specs=[
                pl.BlockSpec((channel_tile * Hout, Cg * Hin),
                             lambda n, j: (j, 0)),                         # A tile
                pl.BlockSpec((Win, Wout), lambda n, j: (0, 0)),            # WwT
                pl.BlockSpec((channel_tile * Hout, 1),
                             lambda n, j: (j, 0)),                         # bias col
                pl.BlockSpec((1, Cg * Hin, Win), lambda n, j: (n, 0, 0)),  # global
                pl.BlockSpec((1, channel_tile * Hout, Wout),
                             lambda n, j: (n, j, 0)),                      # residual
            ],
            out_specs=pl.BlockSpec((1, channel_tile * Hout, Wout),
                                   lambda n, j: (n, j, 0)),
        ),
        input_output_aliases=({4: 0} if donate_feature else {}),
        compiler_params=pltpu.CompilerParams(
            dimension_semantics=("parallel", "parallel"),
            vmem_limit_bytes=vmem_limit,
        ),
        cost_estimate=cost,
    )(A, wwT, cbcol, g2, f2)

    return out.reshape(N, Cf, Hout, Wout)


# ---------------------------------------------------------------------------
# Pure-JAX reference (resize -> conv -> add, exactly like the PyTorch module).
# ---------------------------------------------------------------------------
def _reference(global_feature, feature, conv_weight, conv_bias):
    N, Cg, Hin, Win = global_feature.shape
    _, Cf, Hout, Wout = feature.shape
    wh = _bilinear_matrix(Hin, Hout)
    ww = _bilinear_matrix(Win, Wout)
    resized = jnp.einsum('hi,ncij,wj->nchw', wh, global_feature, ww)
    conv = jnp.einsum('nchw,fc->nfhw', resized, conv_weight.reshape(Cf, Cg))
    return conv + conv_bias[None, :, None, None] + feature


if __name__ == "__main__":
    # Small shapes consistent with the module: low-res global feature upsampled to
    # the feature's spatial size, 1x1 conv Cg->Cf, residual add.
    N, Cg, Cf = 2, 4, 8
    Hin, Win = 8, 8
    Hout, Wout = 16, 16

    key = jax.random.PRNGKey(0)
    k1, k2, k3, k4 = jax.random.split(key, 4)
    global_feature = jax.random.normal(k1, (N, Cg, Hin, Win), dtype=jnp.float32)
    feature = jax.random.normal(k2, (N, Cf, Hout, Wout), dtype=jnp.float32)
    conv_weight = jax.random.normal(k3, (Cf, Cg, 1, 1), dtype=jnp.float32) * 0.1
    conv_bias = jax.random.normal(k4, (Cf,), dtype=jnp.float32) * 0.1

    ref = _reference(global_feature, feature, conv_weight, conv_bias)

    # f32 compute path: tight check (resize/conv reorder is exact in f32).
    # `feature` is donated into the output, so pass a defensive copy.
    out_f32 = feature_fusion_module(global_feature, jnp.copy(feature),
                                    conv_weight, conv_bias,
                                    compute_dtype=jnp.float32)
    out_f32 = jax.block_until_ready(out_f32)
    assert out_f32.shape == (N, Cf, Hout, Wout)
    assert jnp.allclose(out_f32, ref, atol=1e-4, rtol=1e-4)

    # Default bf16 MXU-input path: looser tolerance.
    out_bf16 = feature_fusion_module(global_feature, jnp.copy(feature),
                                     conv_weight, conv_bias)
    out_bf16 = jax.block_until_ready(out_bf16)
    assert out_bf16.shape == (N, Cf, Hout, Wout)
    assert jnp.allclose(out_bf16, ref, atol=3e-2, rtol=3e-2)

    print("KERNEL_OK")
</pallas_src>

<mosaic_0001>
module attributes {stable_mosaic.version = 11 : i64} {
  func.func @_ffm_kernel(%arg0: i32, %arg1: i32, %arg2: memref<128x32xf32, #tpu.memory_space<vmem>>, %arg3: memref<8x16xf32, #tpu.memory_space<vmem>>, %arg4: memref<128x1xf32, #tpu.memory_space<vmem>>, %arg5: memref<1x32x8xf32, #tpu.memory_space<vmem>>, %arg6: memref<1x128x16xf32, #tpu.memory_space<vmem>>, %arg7: memref<1x128x16xf32, #tpu.memory_space<vmem>>) attributes {dimension_semantics = [#tpu.dimension_semantics<parallel>, #tpu.dimension_semantics<parallel>], iteration_bounds = array<i64: 2, 1>, scalar_prefetch = 0 : i64, scratch_operands = 0 : i64, tpu.core_type = #tpu.core_type<tc>, window_params = [{transform_indices = @transform_0, window_bounds = array<i64: 128, 32>}, {pipeline_mode = #tpu.pipeline_mode<synchronous>, transform_indices = @transform_1, window_bounds = array<i64: 8, 16>}, {transform_indices = @transform_2, window_bounds = array<i64: 128, 1>}, {transform_indices = @transform_3, window_bounds = array<i64: 1, 32, 8>}, {transform_indices = @transform_4, window_bounds = array<i64: 1, 128, 16>}, {transform_indices = @transform_5, window_bounds = array<i64: 1, 128, 16>}]} {
    %c0 = arith.constant 0 : index
    %c0_0 = arith.constant 0 : index
    %c0_1 = arith.constant 0 : index
    %0 = vector.load %arg5[%c0, %c0_0, %c0_1] : memref<1x32x8xf32, #tpu.memory_space<vmem>>, vector<1x32x8xf32>
    %1 = vector.shape_cast %0 : vector<1x32x8xf32> to vector<32x8xf32>
    %c0_2 = arith.constant 0 : index
    %c0_3 = arith.constant 0 : index
    %2 = vector.load %arg3[%c0_2, %c0_3] : memref<8x16xf32, #tpu.memory_space<vmem>>, vector<8x16xf32>
    %cst = arith.constant dense<0.000000e+00> : vector<32x16xf32>
    %3 = tpu.matmul %1, %2, %cst {dimension_numbers = #tpu.dot_dimension_numbers<[1], [0], [0], [1], [0, 0, 1, 1], [], []>} : vector<32x8xf32>, vector<8x16xf32>, vector<32x16xf32> -> vector<32x16xf32>
    %c0_4 = arith.constant 0 : index
    %c0_5 = arith.constant 0 : index
    %4 = vector.load %arg2[%c0_4, %c0_5] : memref<128x32xf32, #tpu.memory_space<vmem>>, vector<128x32xf32>
    %cst_6 = arith.constant dense<0.000000e+00> : vector<128x16xf32>
    %5 = tpu.matmul %4, %3, %cst_6 {dimension_numbers = #tpu.dot_dimension_numbers<[1], [0], [0], [1], [0, 0, 1, 1], [], []>} : vector<128x32xf32>, vector<32x16xf32>, vector<128x16xf32> -> vector<128x16xf32>
    %c0_7 = arith.constant 0 : index
    %c0_8 = arith.constant 0 : index
    %6 = vector.load %arg4[%c0_7, %c0_8] : memref<128x1xf32, #tpu.memory_space<vmem>>, vector<128x1xf32>
    %7 = vector.broadcast %6 : vector<128x1xf32> to vector<128x16xf32>
    %8 = arith.addf %5, %7 : vector<128x16xf32>
    %c0_9 = arith.constant 0 : index
    %c0_10 = arith.constant 0 : index
    %c0_11 = arith.constant 0 : index
    %9 = vector.load %arg6[%c0_9, %c0_10, %c0_11] : memref<1x128x16xf32, #tpu.memory_space<vmem>>, vector<1x128x16xf32>
    %10 = vector.shape_cast %9 : vector<1x128x16xf32> to vector<128x16xf32>
    %11 = arith.addf %8, %10 : vector<128x16xf32>
    %c0_12 = arith.constant 0 : index
    %c0_13 = arith.constant 0 : index
    %c0_14 = arith.constant 0 : index
    %12 = vector.load %arg7[%c0_12, %c0_13, %c0_14] : memref<1x128x16xf32, #tpu.memory_space<vmem>>, vector<1x128x16xf32>
    %13 = vector.shape_cast %12 : vector<1x128x16xf32> to vector<128x16xf32>
    %14 = vector.shape_cast %11 : vector<128x16xf32> to vector<1x128x16xf32>
    tpu.vector_store %arg7[%c0_12, %c0_13, %c0_14], %14 {strides = array<i32>} : memref<1x128x16xf32, #tpu.memory_space<vmem>>, vector<1x128x16xf32>,
    return
  }
  func.func @transform_0(%arg0: i32, %arg1: i32) -> (i32, i32) {
    %c0_i32 = arith.constant 0 : i32
    %c0_i32_0 = arith.constant 0 : i32
    return %arg1, %c0_i32 : i32, i32
  }
  func.func @transform_1(%arg0: i32, %arg1: i32) -> (i32, i32) {
    %c0_i32 = arith.constant 0 : i32
    %c0_i32_0 = arith.constant 0 : i32
    %c0_i32_1 = arith.constant 0 : i32
    return %c0_i32, %c0_i32_0 : i32, i32
  }
  func.func @transform_2(%arg0: i32, %arg1: i32) -> (i32, i32) {
    %c0_i32 = arith.constant 0 : i32
    %c0_i32_0 = arith.constant 0 : i32
    return %arg1, %c0_i32 : i32, i32
  }
  func.func @transform_3(%arg0: i32, %arg1: i32) -> (i32, i32, i32) {
    %c0_i32 = arith.constant 0 : i32
    %c0_i32_0 = arith.constant 0 : i32
    %c0_i32_1 = arith.constant 0 : i32
    return %arg0, %c0_i32, %c0_i32_0 : i32, i32, i32
  }
  func.func @transform_4(%arg0: i32, %arg1: i32) -> (i32, i32, i32) {
    %c0_i32 = arith.constant 0 : i32
    %c0_i32_0 = arith.constant 0 : i32
    return %arg0, %arg1, %c0_i32 : i32, i32, i32
  }
  func.func @transform_5(%arg0: i32, %arg1: i32) -> (i32, i32, i32) {
    %c0_i32 = arith.constant 0 : i32
    %c0_i32_0 = arith.constant 0 : i32
    return %arg0, %arg1, %c0_i32 : i32, i32, i32
  }
}

</mosaic_0001>

<bundles_post_ra>
// kernel: tpu_custom_call.1
= control target key start
LH: loop header
LB: loop body
LE: loop exit
PB: predicated region body
PF: predicated region fallthrough
CT: control target
= control target key end

     0   :  { %s1108_s18 = smov 0   ;;  %s1110_s19 = smov 0   ;;  %s1312_s0 = inlined_call_operand.vmem [shape: f32[128,32], index: 0, kind: input, shape index: {}]   ;;  %s1313_s1 = inlined_call_operand.vmem [shape: f32[8,16], index: 1, kind: input, shape index: {}]   ;;  %s1314_s2 = inlined_call_operand.vmem [shape: f32[128,1], index: 2, kind: input, shape index: {}]   ;;  %s1315_s3 = inlined_call_operand.vmem [shape: f32[2,32,8], index: 3, kind: input, shape index: {}]   ;;  %s1316_s4 = inlined_call_operand.vmem [shape: f32[2,128,16], index: 4, kind: input, shape index: {}, may-alias: {4,5}]   ;;  %s1317_s5 = inlined_call_operand.vmem [shape: f32[2,128,16], index: 5, kind: output, shape index: {}, may-alias: {4,5}]  }
   0x1   :  { %s1112_s20 = smov 0  }
   0x2 LB: > { %s27_s21 = sadd.s32 1, %s1071_s19  ;;  %p921_p0 = scmp.ge.s32.totalorder %s1075_s20, 1  ;;  %s1075_s20 = sphi %s1112_s20, %s15_s20   ;;  %s1071_s19 = sphi %s1110_s19, %s1319_s19   ;;  %s1067_s18 = sphi %s1108_s18, %s1318_s18  }
   0x3   : > { %p29_p1 = scmp.ge.s32.totalorder %s27_s21, 2  ;;  %p240_p2 = scmp.lt.s32.totalorder %s1075_s20, 3 }
   0x5   : > { %s1321_s21 = smov (%p29_p1, %s27_s21), 0  ;;  %p241_p3 = pnand %p921_p0, %p240_p2 }
   0x6   : > { %p303_p4 = scmp.lt.s32.totalorder (!%p241_p3), %s1067_s18, 1 }
   0x7   : > { %244 = sbr.rel (%p241_p3) target bundleno = 438 (0x1b6), region = 40 }
   0xc   : > { %v332_v0 = vld [vmem:[%s1313_s1] sm:$0xff]  ;;  %s1323_s18 = smov (!%p303_p4, %s1067_s18), 1  ;;  %vm333_vm0 = vcmask 64512   ;;  %vm543_vm1 = vcmask 261120   ;;  %v437_v6 = vld [vmem:[%s1312_s0 + $0x30] sm:$0xff]  ;;  %v1077_v9 = vmov 0  }
   0xd   : > { %978 = vmatprep.subr.mxu0 %v332_v0  ;;  %s950_s24 = sshll.u32 %s1323_s18, 5  ;;  %v431_v5 = vld [vmem:[%s1312_s0] sm:$0xff]  ;;  %1003 = vmatprep.mubr.msk.f32.mxu1 %vm543_vm1, %v437_v6  ;;  %v449_v7 = vld [vmem:[%s1314_s2 + $0x10] sm:$0xff]  ;;  %v450_v10 = vld [vmem:[%s1314_s2 + $0x18] sm:$0xff]  ;;  %s951_s29 = sshll.u32 %s1323_s18, 7  ;;  %vm769_vm2 = vcmask 130048  }
   0xe   : > { %979 = vmatpush3.msra.mxu0 %v332_v0  ;;  %s307_s27 = scalar_lea.vmem %s1315_s3, %s950_s24  ;;  %v447_v8 = vld [vmem:[%s1314_s2] sm:$0xff]  ;;  %1052 = vset.pattern.permute.xlu1 %v1077_v9  ;;  %v448_v11 = vld [vmem:[%s1314_s2 + $0x8] sm:$0xff]  ;;  %v454_v14 = vld [vmem:[%s1314_s2 + $0x38] sm:$0xff]  ;;  %s316_s7 = scalar_lea.vmem %s1316_s4, %s951_s29 }
   0xf   : > { %v328_v1 = vld [vmem:[%s307_s27] sm:$0xff]  ;;  %v329_v2 = vld [vmem:[%s307_s27 + $0x8] sm:$0xff]  ;;  %v330_v3 = vld [vmem:[%s307_s27 + $0x10] sm:$0xff]  ;;  %1051 = vset.pattern.permute.xlu0 %v1077_v9  ;;  %475 = vperm.xlu1 %1052, %v449_v7   ;;  %s1260_s9 = scalar_lea.vmem %s1317_s5, %s951_s29 }
  0x10   : > { %980 = vmatprep.mubr.msk.f32.mxu0 %vm333_vm0, %v328_v1  ;;  %v331_v4 = vld [vmem:[%s307_s27 + $0x18] sm:$0xff]  ;;  %465 = vperm.xlu0 %1051, %v447_v8   ;;  %v452_v12 = vld [vmem:[%s1314_s2 + $0x28] sm:$0xff]  ;;  %v451_v13 = vld [vmem:[%s1314_s2 + $0x20] sm:$0xff] }
  0x11   : > { %981 = vmatmul.mubr.msk.f32.vlgmr.msra.gmra.mxu0 %vm333_vm0, %v329_v2  ;;  %v453_v15 = vld [vmem:[%s1314_s2 + $0x30] sm:$0xff]  ;;  %v456_v16 = vld [vmem:[%s1314_s2 + $0x48] sm:$0xff]  ;;  %v455_v17 = vld [vmem:[%s1314_s2 + $0x40] sm:$0xff] }
  0x12   : > { %983 = vmatprep.mubr.msk.f32.mxu0 %vm333_vm0, %v330_v3  ;;  %v458_v18 = vld [vmem:[%s1314_s2 + $0x58] sm:$0xff]  ;;  %v457_v19 = vld [vmem:[%s1314_s2 + $0x50] sm:$0xff]  ;;  %v460_v20 = vld [vmem:[%s1314_s2 + $0x68] sm:$0xff] }
  0x13   : > { %480 = vperm.xlu1 %1052, %v450_v10   ;;  %v459_v21 = vld [vmem:[%s1314_s2 + $0x60] sm:$0xff]  ;;  %v462_v22 = vld [vmem:[%s1314_s2 + $0x78] sm:$0xff]  ;;  %v461_v23 = vld [vmem:[%s1314_s2 + $0x70] sm:$0xff] }
  0x14   : > { %470 = vperm.xlu0 %1051, %v448_v11   ;;  %v432_v28 = vld [vmem:[%s1312_s0 + $0x8] sm:$0xff]  ;;  %v438_v29 = vld [vmem:[%s1312_s0 + $0x38] sm:$0xff]  ;;  %v433_v30 = vld [vmem:[%s1312_s0 + $0x10] sm:$0xff] }
  0x15   : > { %984 = vmatmul.mubr.msk.f32.gmra.mxu0 %vm333_vm0, %v331_v4  ;;  %v439_v31 = vld [vmem:[%s1312_s0 + $0x40] sm:$0xff]  ;;  %v434_v32 = vld [vmem:[%s1312_s0 + $0x18] sm:$0xff]  ;;  %v440_v33 = vld [vmem:[%s1312_s0 + $0x48] sm:$0xff] }
  0x16   : > { %994 = vmatprep.mubr.msk.f32.mxu0 %vm543_vm1, %v431_v5  ;;  %v435_v34 = vld [vmem:[%s1312_s0 + $0x20] sm:$0xff]  ;;  %v441_v35 = vld [vmem:[%s1312_s0 + $0x50] sm:$0xff]  ;;  %v436_v36 = vld [vmem:[%s1312_s0 + $0x28] sm:$0xff] }
  0x17   : > { %490 = vperm.xlu1 %1052, %v452_v12   ;;  %v442_v37 = vld [vmem:[%s1312_s0 + $0x58] sm:$0xff]  ;;  %v443_v38 = vld [vmem:[%s1312_s0 + $0x60] sm:$0xff]  ;;  %v444_v39 = vld [vmem:[%s1312_s0 + $0x68] sm:$0xff] }
  0x18   : > { %485 = vperm.xlu0 %1051, %v451_v13   ;;  %v445_v40 = vld [vmem:[%s1312_s0 + $0x70] sm:$0xff]  ;;  %v446_v41 = vld [vmem:[%s1312_s0 + $0x78] sm:$0xff]  ;;  %v738_v51 = vld [vmem:[%s316_s7 + $0x8] sm:$0xff] }
  0x19   : > { %v737_v53 = vld [vmem:[%s316_s7] sm:$0xff]  ;;  %v739_v54 = vld [vmem:[%s316_s7 + $0x10] sm:$0xff]  ;;  %v740_v55 = vld [vmem:[%s316_s7 + $0x18] sm:$0xff] }
  0x1a   : > { %v1253_v56 = vld [vmem:[%s316_s7 + $0x20] sm:$0xff]  ;;  %v742_v57 = vld [vmem:[%s316_s7 + $0x28] sm:$0xff]  ;;  %v743_v58 = vld [vmem:[%s316_s7 + $0x30] sm:$0xff] }
  0x1b   : > { %500 = vperm.xlu1 %1052, %v454_v14   ;;  %v744_v59 = vld [vmem:[%s316_s7 + $0x38] sm:$0xff]  ;;  %v745_v60 = vld [vmem:[%s316_s7 + $0x40] sm:$0xff]  ;;  %v746_v61 = vld [vmem:[%s316_s7 + $0x48] sm:$0xff] }
  0x1c   : > { %495 = vperm.xlu0 %1051, %v453_v15   ;;  %v747_v0 = vld [vmem:[%s316_s7 + $0x50] sm:$0xff]  ;;  %v748_v1 = vld [vmem:[%s316_s7 + $0x58] sm:$0xff]  ;;  %v1255_v2 = vld [vmem:[%s316_s7 + $0x60] sm:$0xff] }
  0x1d   : > { %v750_v5 = vld [vmem:[%s316_s7 + $0x68] sm:$0xff]  ;;  %v1262_v6 = vld [vmem:[%s316_s7 + $0x70] sm:$0xff]  ;;  %v1264_v7 = vld [vmem:[%s316_s7 + $0x78] sm:$0xff] }
  0x1f   : > { %510 = vperm.xlu1 %1052, %v456_v16  }
  0x20   : > { %505 = vperm.xlu0 %1051, %v455_v17  }
  0x23   : > { %520 = vperm.xlu1 %1052, %v458_v18  }
  0x24   : > { %515 = vperm.xlu0 %1051, %v457_v19  }
  0x27   : > { %530 = vperm.xlu1 %1052, %v460_v20  }
  0x28   : > { %525 = vperm.xlu0 %1051, %v459_v21  }
  0x2b   : > { %540 = vperm.xlu1 %1052, %v462_v22  }
  0x2c   : > { %535 = vperm.xlu0 %1051, %v461_v23  }
  0x8a   : > { %v476_v42 = vpop.permute.xlu1 %475 }
  0x8b   : > { %v466_v43 = vpop.permute.xlu0 %465 }
  0x8e   : > { %v481_v44 = vpop.permute.xlu1 %480 }
  0x8f   : > { %v471_v45 = vpop.permute.xlu0 %470 }
  0x92   : > { %v491_v46 = vpop.permute.xlu1 %490 }
  0x93   : > { %v1247_v47 = vpop.permute.xlu0 %485 }
  0x96   : > { %v501_v48 = vpop.permute.xlu1 %500 }
  0x97   : > { %v496_v49 = vpop.permute.xlu0 %495 }
  0x9a   : > { %v511_v50 = vpop.permute.xlu1 %510 }
  0x9b   : > { %v506_v52 = vpop.permute.xlu0 %505 }
  0x9e   : > { %v521_v10 = vpop.permute.xlu1 %520 }
  0x9f   : > { %v516_v17 = vpop.permute.xlu0 %515 }
  0xd1   : > { %v982_v24 = vpop.f32.mrf.mxu0 }
  0xd3   : > { %v412_v25 = vpop.f32.mrf.mxu0 }
  0xd5   : > { %v985_v26 = vpop.f32.mrf.mxu0 }
  0xd6   : > { %986 = vmatprep.subr.mxu0 %v985_v26  ;;  %1018 = vmatprep.subr.mxu1 %v985_v26 }
  0xd7   : > { %v422_v27 = vpop.f32.mrf.mxu0  ;;  %987 = vmatpush3.msra.mxu0 %v985_v26  ;;  %1022 = vmatpush3.msra.mxu1 %v985_v26 }
  0xd8   : > { %988 = vmatprep.subr.mxu0 %v422_v27  ;;  %1019 = vmatprep.subr.mxu1 %v422_v27 }
  0xd9   : > { %989 = vmatpush3.msra.mxu0 %v422_v27  ;;  %1023 = vmatpush3.msra.mxu1 %v422_v27 }
  0xda   : > { %990 = vmatprep.subr.mxu0 %v982_v24  ;;  %1020 = vmatprep.subr.mxu1 %v982_v24 }
  0xdb   : > { %991 = vmatpush3.msra.mxu0 %v982_v24  ;;  %1024 = vmatpush3.msra.mxu1 %v982_v24 }
  0xdc   : > { %992 = vmatprep.subr.mxu0 %v412_v25  ;;  %1021 = vmatprep.subr.mxu1 %v412_v25 }
  0xdd   : > { %993 = vmatpush3.msra.mxu0 %v412_v25  ;;  %1025 = vmatpush3.msra.mxu1 %v412_v25 }
  0xde   : > { %995 = vmatmul.mubr.msk.f32.vlgmr.msra.gmra.mxu0 %vm543_vm1, %v432_v28  ;;  %1004 = vmatmul.mubr.msk.f32.vlgmr.msra.gmra.mxu1 %vm543_vm1, %v438_v29 }
  0xdf   : > { %997 = vmatprep.mubr.msk.f32.mxu0 %vm543_vm1, %v433_v30  ;;  %1006 = vmatprep.mubr.msk.f32.mxu1 %vm543_vm1, %v439_v31  ;;  %v531_v30 = vpop.permute.xlu1 %530 }
  0xe2   : > { %998 = vmatmul.mubr.msk.f32.gmra.mxu0 %vm543_vm1, %v434_v32  ;;  %1007 = vmatmul.mubr.msk.f32.gmra.mxu1 %vm543_vm1, %v440_v33 }
  0xe3   : > { %1000 = vmatprep.mubr.msk.f32.mxu0 %vm543_vm1, %v435_v34  ;;  %1009 = vmatprep.mubr.msk.f32.mxu1 %vm543_vm1, %v441_v35 }
  0xe6   : > { %1001 = vmatmul.mubr.msk.f32.gmra.mxu0 %vm543_vm1, %v436_v36  ;;  %1010 = vmatmul.mubr.msk.f32.gmra.mxu1 %vm543_vm1, %v442_v37 }
  0xe7   : > { %1012 = vmatprep.mubr.msk.f32.mxu1 %vm543_vm1, %v443_v38 }
  0xea   : > { %1013 = vmatmul.mubr.msk.f32.gmra.mxu1 %vm543_vm1, %v444_v39 }
  0xeb   : > { %1015 = vmatprep.mubr.msk.f32.mxu1 %vm543_vm1, %v445_v40 }
  0xee   : > { %1016 = vmatmul.mubr.msk.f32.gmra.mxu1 %vm543_vm1, %v446_v41  ;;  %v526_v41 = vpop.permute.xlu0 %525 }
 0x19e   : > { %v996_v62 = vpop.f32.mrf.mxu0  ;;  %v1005_v63 = vpop.f32.mrf.mxu1 }
 0x19f   : > { %v664_v3 = vadd.f32 %v996_v62, %v471_v45  ;;  %v694_v4 = vadd.f32 %v1005_v63, %v501_v48 }
 0x1a0   : > { %v658_v8 = vpop.f32.mrf.mxu0  ;;  %v688_v9 = vpop.f32.mrf.mxu1 }
 0x1a1   : > { %v754_v11 = vadd.f32 %v738_v51, %v664_v3  ;;  %v760_v12 = vadd.f32 %v744_v59, %v694_v4  ;;  %v659_v13 = vadd.f32 %v658_v8, %v466_v43  ;;  %v689_v14 = vadd.f32 %v688_v9, %v496_v49  ;;  %v541_v49 = vpop.permute.xlu1 %540 }
 0x1a2   : > { %v999_v15 = vpop.f32.mrf.mxu0  ;;  %v1008_v16 = vpop.f32.mrf.mxu1 }
 0x1a3   : > { %771 = vst.msk [vmem:[%s1260_s9 + $0x8] sm:$0xff] %vm769_vm2, %v754_v11  ;;  %777 = vst.msk [vmem:[%s1260_s9 + $0x38] sm:$0xff] %vm769_vm2, %v760_v12  ;;  %v753_v18 = vadd.f32 %v737_v53, %v659_v13  ;;  %v759_v19 = vadd.f32 %v743_v58, %v689_v14  ;;  %v674_v20 = vadd.f32 %v999_v15, %v481_v44  ;;  %v536_v53 = vpop.permute.xlu0 %535 }
 0x1a4   : > { %v704_v21 = vadd.f32 %v1008_v16, %v511_v50  ;;  %v668_v22 = vpop.f32.mrf.mxu0  ;;  %v698_v23 = vpop.f32.mrf.mxu1 }
 0x1a5   : > { %770 = vst.msk [vmem:[%s1260_s9] sm:$0xff] %vm769_vm2, %v753_v18  ;;  %776 = vst.msk [vmem:[%s1260_s9 + $0x30] sm:$0xff] %vm769_vm2, %v759_v19  ;;  %v756_v24 = vadd.f32 %v740_v55, %v674_v20  ;;  %v669_v26 = vadd.f32 %v668_v22, %v476_v42  ;;  %v699_v27 = vadd.f32 %v698_v23, %v506_v52 }
 0x1a6   : > { %v762_v25 = vadd.f32 %v746_v61, %v704_v21  ;;  %v1002_v28 = vpop.f32.mrf.mxu0  ;;  %v1011_v29 = vpop.f32.mrf.mxu1 }
 0x1a7   : > { %773 = vst.msk [vmem:[%s1260_s9 + $0x18] sm:$0xff] %vm769_vm2, %v756_v24  ;;  %v755_v31 = vadd.f32 %v739_v54, %v669_v26  ;;  %v761_v32 = vadd.f32 %v745_v60, %v699_v27  ;;  %v684_v33 = vadd.f32 %v1002_v28, %v491_v46  ;;  %v714_v34 = vadd.f32 %v1011_v29, %v521_v10 }
 0x1a8   : > { %779 = vst.msk [vmem:[%s1260_s9 + $0x48] sm:$0xff] %vm769_vm2, %v762_v25  ;;  %v678_v35 = vpop.f32.mrf.mxu0  ;;  %v708_v36 = vpop.f32.mrf.mxu1 }
 0x1a9   : > { %772 = vst.msk [vmem:[%s1260_s9 + $0x10] sm:$0xff] %vm769_vm2, %v755_v31  ;;  %778 = vst.msk [vmem:[%s1260_s9 + $0x40] sm:$0xff] %vm769_vm2, %v761_v32  ;;  %v758_v37 = vadd.f32 %v742_v57, %v684_v33  ;;  %v764_v38 = vadd.f32 %v748_v1, %v714_v34  ;;  %v679_v39 = vadd.f32 %v678_v35, %v1247_v47 }
 0x1aa   : > { %v709_v40 = vadd.f32 %v708_v36, %v516_v17  ;;  %v1014_v42 = vpop.f32.mrf.mxu1 }
 0x1ab   : > { %775 = vst.msk [vmem:[%s1260_s9 + $0x28] sm:$0xff] %vm769_vm2, %v758_v37  ;;  %781 = vst.msk [vmem:[%s1260_s9 + $0x58] sm:$0xff] %vm769_vm2, %v764_v38  ;;  %v757_v43 = vadd.f32 %v1253_v56, %v679_v39  ;;  %v724_v45 = vadd.f32 %v1014_v42, %v531_v30 }
 0x1ac   : > { %v763_v44 = vadd.f32 %v747_v0, %v709_v40  ;;  %v718_v46 = vpop.f32.mrf.mxu1 }
 0x1ad   : > { %774 = vst.msk [vmem:[%s1260_s9 + $0x20] sm:$0xff] %vm769_vm2, %v757_v43  ;;  %v766_v47 = vadd.f32 %v750_v5, %v724_v45  ;;  %v719_v48 = vadd.f32 %v718_v46, %v526_v41 }
 0x1ae   : > { %780 = vst.msk [vmem:[%s1260_s9 + $0x50] sm:$0xff] %vm769_vm2, %v763_v44  ;;  %v1017_v50 = vpop.f32.mrf.mxu1 }
 0x1af   : > { %783 = vst.msk [vmem:[%s1260_s9 + $0x68] sm:$0xff] %vm769_vm2, %v766_v47  ;;  %v765_v51 = vadd.f32 %v1255_v2, %v719_v48  ;;  %v734_v52 = vadd.f32 %v1017_v50, %v541_v49 }
 0x1b0   : > { %v728_v54 = vpop.f32.mrf.mxu1 }
 0x1b1   : > { %782 = vst.msk [vmem:[%s1260_s9 + $0x60] sm:$0xff] %vm769_vm2, %v765_v51  ;;  %v768_v55 = vadd.f32 %v1264_v7, %v734_v52  ;;  %v729_v56 = vadd.f32 %v728_v54, %v536_v53 }
 0x1b3   : > { %785 = vst.msk [vmem:[%s1260_s9 + $0x78] sm:$0xff] %vm769_vm2, %v768_v55  ;;  %v767_v57 = vadd.f32 %v1262_v6, %v729_v56 }
 0x1b5   : > { %784 = vst.msk [vmem:[%s1260_s9 + $0x70] sm:$0xff] %vm769_vm2, %v767_v57 }
 0x1b6 PF: > { %s15_s20 = sadd.s32 1, %s1075_s20   ;;  %s1318_s18 = smov %s1071_s19 }
 0x1b7   : > { %p12_p5 = scmp.ge.s32.totalorder %s15_s20, 4   ;;  %s1319_s19 = smov %s1321_s21 }
 0x1b9   :  { %14 = sbr.rel (!%p12_p5) target bundleno = 2 (0x2), region = 79 }

</bundles_post_ra>
